<compile_context>
chip_gen: v7x
topology: tpu7x:2x2x1
jax: 0.10.0
libtpu: 0.0.40
codegen_flags: <defaults>
</compile_context>

<pallas_src>
import jax
import jax.numpy as jnp
from jax.experimental import pallas as pl
from jax.experimental.pallas import tpu as pltpu

LANE = 128     # f32 lane width
SUBLANE = 8    # f32 sublane count
NEG_MASK = -1e30   # finite "-inf": exp underflows to exactly 0 in f32


def _round_up(x, m):
    return (x + m - 1) // m * m


def actor_net_kernel(x_ref, w1_ref, b1_ref, w2_ref, b2_ref, out_ref):
    # x_ref:  (TB, n_states)        batch tile (auto double-buffered)
    # w1_ref: (n_states, H_PAD)     VMEM-resident across all grid steps
    # b1_ref: (1, H_PAD)
    # w2_ref: (H_PAD, A_PAD)        padded rows are zero
    # b2_ref: (1, A_PAD)            padded lanes carry NEG_MASK (softmax mask)
    # out_ref:(TB, A_PAD)           lane-dense output tile
    x = x_ref[...]

    # fc1 + ReLU (MXU matmul, f32 accumulation).
    h = jnp.dot(x, w1_ref[...], preferred_element_type=jnp.float32) + b1_ref[...]
    h = jnp.maximum(h, 0.0)

    # fc2 (MXU). Padded action lanes get NEG_MASK from the bias.
    logits = jnp.dot(h, w2_ref[...], preferred_element_type=jnp.float32) + b2_ref[...]

    # Numerically stable softmax over dim=1 (last axis here). Padded lanes
    # contribute exp(NEG_MASK - m) == 0, so the distribution is unchanged.
    m = jnp.max(logits, axis=-1, keepdims=True)
    e = jnp.exp(logits - m)
    denom = jnp.sum(e, axis=-1, keepdims=True)
    out_ref[...] = (e * pl.reciprocal(denom, approx=False)).astype(out_ref.dtype)


def actor_net_forward(x, w1, b1, w2, b2, *, block_batch=512):
    """x: (B, n_states); w1: (n_states, n_hidden); w2: (n_hidden, n_actions)."""
    batch, n_states = x.shape
    n_hidden = w1.shape[1]
    n_actions = w2.shape[1]

    h_pad = _round_up(n_hidden, LANE)
    a_pad = _round_up(n_actions, LANE)

    # Lane-dense padding of the (tiny) parameters.
    #  * padded hidden units: zero weights/bias -> exactly 0 after ReLU and
    #    zero w2 rows -> no contribution to logits.
    #  * padded action lanes: NEG_MASK bias -> softmax weight exactly 0.
    w1_p = jnp.zeros((n_states, h_pad), jnp.float32).at[:, :n_hidden].set(w1)
    b1_p = jnp.zeros((1, h_pad), jnp.float32).at[:, :n_hidden].set(b1.reshape(1, -1))
    w2_p = jnp.zeros((h_pad, a_pad), jnp.float32).at[:n_hidden, :n_actions].set(w2)
    b2_p = jnp.full((1, a_pad), NEG_MASK, jnp.float32).at[:, :n_actions].set(
        b2.reshape(1, -1))

    # Batch tile: multiple of 8 sublanes, capped so (TB, 128) f32 tiles stay
    # tiny relative to VMEM even with double buffering.
    tb = min(_round_up(batch, SUBLANE), block_batch)
    b_pad = _round_up(batch, tb)
    if b_pad != batch:
        x_p = jnp.zeros((b_pad, n_states), x.dtype).at[:batch].set(x)
    else:
        x_p = x

    out = pl.pallas_call(
        actor_net_kernel,
        out_shape=jax.ShapeDtypeStruct((b_pad, a_pad), jnp.float32),
        grid_spec=pltpu.PrefetchScalarGridSpec(
            num_scalar_prefetch=0,
            grid=(b_pad // tb,),
            in_specs=[
                # batch-tiled activations (auto double-buffered)
                pl.BlockSpec((tb, n_states), lambda i: (i, 0)),
                # VMEM-resident parameters (same block every grid step)
                pl.BlockSpec((n_states, h_pad), lambda i: (0, 0)),
                pl.BlockSpec((1, h_pad), lambda i: (0, 0)),
                pl.BlockSpec((h_pad, a_pad), lambda i: (0, 0)),
                pl.BlockSpec((1, a_pad), lambda i: (0, 0)),
            ],
            out_specs=pl.BlockSpec((tb, a_pad), lambda i: (i, 0)),
        ),
        compiler_params=pltpu.CompilerParams(
            dimension_semantics=("parallel",),   # shard batch over v7x's 2 TCs
        ),
    )(x_p, w1_p, b1_p, w2_p, b2_p)

    # Slice away batch padding and padded action lanes.
    return out[:batch, :n_actions]


def init_params(key, n_states, n_actions, n_hidden):
    """Deterministic init mimicking torch.nn.Linear's U(-1/sqrt(fan_in), 1/sqrt(fan_in))."""
    k1, k2, k3, k4 = jax.random.split(key, 4)
    bound1 = 1.0 / jnp.sqrt(n_states)
    bound2 = 1.0 / jnp.sqrt(n_hidden)
    # Stored already-transposed relative to torch: (in_features, out_features)
    w1 = jax.random.uniform(k1, (n_states, n_hidden), jnp.float32, -bound1, bound1)
    b1 = jax.random.uniform(k2, (1, n_hidden), jnp.float32, -bound1, bound1)
    w2 = jax.random.uniform(k3, (n_hidden, n_actions), jnp.float32, -bound2, bound2)
    b2 = jax.random.uniform(k4, (1, n_actions), jnp.float32, -bound2, bound2)
    return w1, b1, w2, b2


if __name__ == "__main__":
    # ActorNet(n_states=4, n_actions=2, n_hidden=32); batch amortizes launch overhead.
    batch, n_states, n_actions, n_hidden = 128, 4, 2, 32

    key = jax.random.PRNGKey(0)
    kx, kp = jax.random.split(key)
    x = jax.random.normal(kx, (batch, n_states), dtype=jnp.float32)
    w1, b1, w2, b2 = init_params(kp, n_states, n_actions, n_hidden)

    out = actor_net_forward(x, w1, b1, w2, b2)
    out = jax.block_until_ready(out)

    # Pure-JAX reference (same math, outside Pallas)
    h_ref = jnp.maximum(x @ w1 + b1, 0.0)
    ref = jax.nn.softmax(h_ref @ w2 + b2, axis=1)
    assert out.shape == (batch, n_actions)
    assert jnp.allclose(out, ref, atol=1e-5, rtol=1e-5)
    assert jnp.allclose(jnp.sum(out, axis=1), 1.0, atol=1e-5)

    print("KERNEL_OK")
</pallas_src>

<mosaic_0001>
module attributes {stable_mosaic.version = 11 : i64} {
  func.func @actor_net_kernel(%arg0: i32, %arg1: memref<128x4xf32, #tpu.memory_space<vmem>>, %arg2: memref<4x128xf32, #tpu.memory_space<vmem>>, %arg3: memref<1x128xf32, #tpu.memory_space<vmem>>, %arg4: memref<128x128xf32, #tpu.memory_space<vmem>>, %arg5: memref<1x128xf32, #tpu.memory_space<vmem>>, %arg6: memref<128x128xf32, #tpu.memory_space<vmem>>) attributes {dimension_semantics = [#tpu.dimension_semantics<parallel>], iteration_bounds = array<i64: 1>, scalar_prefetch = 0 : i64, scratch_operands = 0 : i64, tpu.core_type = #tpu.core_type<tc>, window_params = [{transform_indices = @transform_0, window_bounds = array<i64: 128, 4>}, {pipeline_mode = #tpu.pipeline_mode<synchronous>, transform_indices = @transform_1, window_bounds = array<i64: 4, 128>}, {pipeline_mode = #tpu.pipeline_mode<synchronous>, transform_indices = @transform_2, window_bounds = array<i64: 1, 128>}, {pipeline_mode = #tpu.pipeline_mode<synchronous>, transform_indices = @transform_3, window_bounds = array<i64: 128, 128>}, {pipeline_mode = #tpu.pipeline_mode<synchronous>, transform_indices = @transform_4, window_bounds = array<i64: 1, 128>}, {transform_indices = @transform_5, window_bounds = array<i64: 128, 128>}]} {
    %c0 = arith.constant 0 : index
    %c0_0 = arith.constant 0 : index
    %0 = vector.load %arg1[%c0, %c0_0] : memref<128x4xf32, #tpu.memory_space<vmem>>, vector<128x4xf32>
    %c0_1 = arith.constant 0 : index
    %c0_2 = arith.constant 0 : index
    %1 = vector.load %arg2[%c0_1, %c0_2] : memref<4x128xf32, #tpu.memory_space<vmem>>, vector<4x128xf32>
    %cst = arith.constant dense<0.000000e+00> : vector<128x128xf32>
    %2 = tpu.matmul %0, %1, %cst {dimension_numbers = #tpu.dot_dimension_numbers<[1], [0], [0], [1], [0, 0, 1, 1], [], []>} : vector<128x4xf32>, vector<4x128xf32>, vector<128x128xf32> -> vector<128x128xf32>
    %c0_3 = arith.constant 0 : index
    %c0_4 = arith.constant 0 : index
    %3 = vector.load %arg3[%c0_3, %c0_4] : memref<1x128xf32, #tpu.memory_space<vmem>>, vector<1x128xf32>
    %4 = vector.broadcast %3 : vector<1x128xf32> to vector<128x128xf32>
    %5 = arith.addf %2, %4 : vector<128x128xf32>
    %cst_5 = arith.constant 0.000000e+00 : f32
    %6 = vector.broadcast %cst_5 : f32 to vector<128x128xf32>
    %7 = arith.maximumf %5, %6 : vector<128x128xf32>
    %c0_6 = arith.constant 0 : index
    %c0_7 = arith.constant 0 : index
    %8 = vector.load %arg4[%c0_6, %c0_7] : memref<128x128xf32, #tpu.memory_space<vmem>>, vector<128x128xf32>
    %cst_8 = arith.constant dense<0.000000e+00> : vector<128x128xf32>
    %9 = tpu.matmul %7, %8, %cst_8 {dimension_numbers = #tpu.dot_dimension_numbers<[1], [0], [0], [1], [0, 0, 1, 1], [], []>} : vector<128x128xf32>, vector<128x128xf32>, vector<128x128xf32> -> vector<128x128xf32>
    %c0_9 = arith.constant 0 : index
    %c0_10 = arith.constant 0 : index
    %10 = vector.load %arg5[%c0_9, %c0_10] : memref<1x128xf32, #tpu.memory_space<vmem>>, vector<1x128xf32>
    %11 = vector.broadcast %10 : vector<1x128xf32> to vector<128x128xf32>
    %12 = arith.addf %9, %11 : vector<128x128xf32>
    %cst_11 = arith.constant dense<0xFF800000> : vector<128xf32>
    %13 = vector.multi_reduction <maximumf>, %12, %cst_11 [1] : vector<128x128xf32> to vector<128xf32>
    %14 = vector.shape_cast %13 : vector<128xf32> to vector<128x1xf32>
    %15 = vector.broadcast %14 : vector<128x1xf32> to vector<128x128xf32>
    %16 = arith.subf %12, %15 : vector<128x128xf32>
    %17 = math.exp %16 : vector<128x128xf32>
    %cst_12 = arith.constant dense<0.000000e+00> : vector<128xf32>
    %18 = vector.multi_reduction <add>, %17, %cst_12 [1] : vector<128x128xf32> to vector<128xf32>
    %19 = vector.shape_cast %18 : vector<128xf32> to vector<128x1xf32>
    %20 = tpu.reciprocal %19 : vector<128x1xf32> -> vector<128x1xf32>
    %21 = vector.broadcast %20 : vector<128x1xf32> to vector<128x128xf32>
    %22 = arith.mulf %17, %21 : vector<128x128xf32>
    %c0_13 = arith.constant 0 : index
    %c0_14 = arith.constant 0 : index
    %23 = vector.load %arg6[%c0_13, %c0_14] : memref<128x128xf32, #tpu.memory_space<vmem>>, vector<128x128xf32>
    tpu.vector_store %arg6[%c0_13, %c0_14], %22 {strides = array<i32>} : memref<128x128xf32, #tpu.memory_space<vmem>>, vector<128x128xf32>,
    return
  }
  func.func @transform_0(%arg0: i32) -> (i32, i32) {
    %c0_i32 = arith.constant 0 : i32
    %c0_i32_0 = arith.constant 0 : i32
    return %arg0, %c0_i32 : i32, i32
  }
  func.func @transform_1(%arg0: i32) -> (i32, i32) {
    %c0_i32 = arith.constant 0 : i32
    %c0_i32_0 = arith.constant 0 : i32
    %c0_i32_1 = arith.constant 0 : i32
    return %c0_i32, %c0_i32_0 : i32, i32
  }
  func.func @transform_2(%arg0: i32) -> (i32, i32) {
    %c0_i32 = arith.constant 0 : i32
    %c0_i32_0 = arith.constant 0 : i32
    %c0_i32_1 = arith.constant 0 : i32
    return %c0_i32, %c0_i32_0 : i32, i32
  }
  func.func @transform_3(%arg0: i32) -> (i32, i32) {
    %c0_i32 = arith.constant 0 : i32
    %c0_i32_0 = arith.constant 0 : i32
    %c0_i32_1 = arith.constant 0 : i32
    return %c0_i32, %c0_i32_0 : i32, i32
  }
  func.func @transform_4(%arg0: i32) -> (i32, i32) {
    %c0_i32 = arith.constant 0 : i32
    %c0_i32_0 = arith.constant 0 : i32
    %c0_i32_1 = arith.constant 0 : i32
    return %c0_i32, %c0_i32_0 : i32, i32
  }
  func.func @transform_5(%arg0: i32) -> (i32, i32) {
    %c0_i32 = arith.constant 0 : i32
    %c0_i32_0 = arith.constant 0 : i32
    return %arg0, %c0_i32 : i32, i32
  }
}

</mosaic_0001>

<bundles_post_ra>
// kernel: tpu_custom_call.1
= control target key start
LH: loop header
LB: loop body
LE: loop exit
PB: predicated region body
PF: predicated region fallthrough
CT: control target
= control target key end

     0   :  { %vm94_vm0 = vcmask 1043456   ;;  %vm45_vm1 = vcmask 31744   ;;  %s1154_s0 = inlined_call_operand.vmem [shape: f32[128,4], index: 0, kind: input, shape index: {}]   ;;  %s1155_s1 = inlined_call_operand.vmem [shape: f32[4,128], index: 1, kind: input, shape index: {}]   ;;  %s1156_s2 = inlined_call_operand.vmem [shape: f32[1,128], index: 2, kind: input, shape index: {}]   ;;  %s1157_s3 = inlined_call_operand.vmem [shape: f32[128,128], index: 3, kind: input, shape index: {}]   ;;  %s1158_s4 = inlined_call_operand.vmem [shape: f32[1,128], index: 4, kind: input, shape index: {}]   ;;  %s1159_s5 = inlined_call_operand.hbm [shape: f32[128,128], index: 5, kind: output, shape index: {}]  }
   0x1   :  { %v37_v0 = vld [vmem:[%s1155_s1] sm:$0xf]  ;;  %v22_v2 = vld [vmem:[%s1154_s0 + $0x8] sm:$0xff]  ;;  %v23_v3 = vld [vmem:[%s1154_s0 + $0x10] sm:$0xff] }
   0x2   :  { %v21_v1 = vld [vmem:[%s1154_s0] sm:$0xff]  ;;  %671 = vmatprep.subr.msk.mxu0 %vm94_vm0, %v37_v0  ;;  %v24_v4 = vld [vmem:[%s1154_s0 + $0x18] sm:$0xff]  ;;  %v260_v7 = vld [vmem:[%s1157_s3 + $0x8] sm:$0xff] }
   0x3   :  { %673 = vmatprep.mubr.msk.f32.mxu0 %vm45_vm1, %v21_v1  ;;  %672 = vmatpush3.msk.msra.mxu0 %vm94_vm0, %v37_v0  ;;  %v25_v5 = vld [vmem:[%s1154_s0 + $0x20] sm:$0xff]  ;;  %v261_v8 = vld [vmem:[%s1157_s3 + $0x10] sm:$0xff]  ;;  %v262_v9 = vld [vmem:[%s1157_s3 + $0x18] sm:$0xff] }
   0x4   :  { %674 = vmatmul.mubr.msk.f32.vlgmr.msra.gmra.mrb[0].mxu0 %vm45_vm1, %v22_v2  ;;  %v259_v6 = vld [vmem:[%s1157_s3] sm:$0xff]  ;;  %v757_v11 = vpack.c.bf16 %v262_v9, %v261_v8  ;;  %v26_v12 = vld [vmem:[%s1154_s0 + $0x28] sm:$0xff]  ;;  %v27_v15 = vld [vmem:[%s1154_s0 + $0x30] sm:$0xff] }
   0x5   :  { %676 = vmatprep.mubr.msk.f32.mxu0 %vm45_vm1, %v23_v3  ;;  %v753_v10 = vpack.c.bf16 %v260_v7, %v259_v6  ;;  %v263_v13 = vld [vmem:[%s1157_s3 + $0x20] sm:$0xff]  ;;  %v264_v14 = vld [vmem:[%s1157_s3 + $0x28] sm:$0xff] }
   0x7   :  { %754 = vmatprep.subr.bf16.mxu0 %v753_v10  ;;  %785 = vmatprep.subr.bf16.mxu1 %v753_v10 }
   0x8   :  { %677 = vmatmul.mubr.msk.f32.gmra.mrb[2].mxu0 %vm45_vm1, %v24_v4  ;;  %793 = vmatpush3.bf16.msra.mxu1 %v753_v10 }
   0x9   :  { %679 = vmatprep.mubr.msk.f32.mxu0 %vm45_vm1, %v25_v5  ;;  %756 = vmatpush3.bf16.msra.mxu0 %v753_v10 }
   0xa   :  { %10 = vsyncpa [#allocation3], 0  ;;  %758 = vmatprep.subr.bf16.mxu0 %v757_v11  ;;  %v761_v16 = vpack.c.bf16 %v264_v14, %v263_v13  ;;  %v28_v17 = vld [vmem:[%s1154_s0 + $0x38] sm:$0xff]  ;;  %v265_v18 = vld [vmem:[%s1157_s3 + $0x30] sm:$0xff]  ;;  %786 = vmatprep.subr.bf16.mxu1 %v757_v11 }
   0xb   :  { %v266_v19 = vld [vmem:[%s1157_s3 + $0x38] sm:$0xff]  ;;  %v29_v20 = vld [vmem:[%s1154_s0 + $0x40] sm:$0xff]  ;;  %v30_v22 = vld [vmem:[%s1154_s0 + $0x48] sm:$0xff] }
   0xc   :  { %680 = vmatmul.mubr.msk.f32.gmra.mrb[4].mxu0 %vm45_vm1, %v26_v12  ;;  %794 = vmatpush3.bf16.msra.mxu1 %v757_v11  ;;  %v765_v21 = vpack.c.bf16 %v266_v19, %v265_v18  ;;  %v267_v23 = vld [vmem:[%s1157_s3 + $0x40] sm:$0xff]  ;;  %v268_v24 = vld [vmem:[%s1157_s3 + $0x48] sm:$0xff]  ;;  %v31_v25 = vld [vmem:[%s1154_s0 + $0x50] sm:$0xff] }
   0xd   :  { %682 = vmatprep.mubr.msk.f32.mxu0 %vm45_vm1, %v27_v15  ;;  %760 = vmatpush3.bf16.msra.mxu0 %v757_v11  ;;  %v769_v26 = vpack.c.bf16 %v268_v24, %v267_v23  ;;  %v32_v27 = vld [vmem:[%s1154_s0 + $0x58] sm:$0xff]  ;;  %v269_v28 = vld [vmem:[%s1157_s3 + $0x50] sm:$0xff]  ;;  %v33_v30 = vld [vmem:[%s1154_s0 + $0x60] sm:$0xff] }
   0xe   :  { %762 = vmatprep.subr.bf16.mxu0 %v761_v16  ;;  %787 = vmatprep.subr.bf16.mxu1 %v761_v16  ;;  %v270_v29 = vld [vmem:[%s1157_s3 + $0x58] sm:$0xff]  ;;  %v34_v32 = vld [vmem:[%s1154_s0 + $0x68] sm:$0xff]  ;;  %v271_v33 = vld [vmem:[%s1157_s3 + $0x60] sm:$0xff] }
   0xf   :  { %v773_v31 = vpack.c.bf16 %v270_v29, %v269_v28  ;;  %v272_v34 = vld [vmem:[%s1157_s3 + $0x68] sm:$0xff]  ;;  %v35_v35 = vld [vmem:[%s1154_s0 + $0x70] sm:$0xff]  ;;  %v36_v37 = vld [vmem:[%s1154_s0 + $0x78] sm:$0xff] }
  0x10   :  { %683 = vmatmul.mubr.msk.f32.gmra.mrb[6].mxu0 %vm45_vm1, %v28_v17  ;;  %795 = vmatpush3.bf16.msra.mxu1 %v761_v16  ;;  %v777_v36 = vpack.c.bf16 %v272_v34, %v271_v33  ;;  %v273_v38 = vld [vmem:[%s1157_s3 + $0x70] sm:$0xff]  ;;  %v274_v39 = vld [vmem:[%s1157_s3 + $0x78] sm:$0xff]  ;;  %v603_v41 = vld [vmem:[%s1156_s2] ss:$0 sm:$0xff] }
  0x11   :  { %685 = vmatprep.mubr.msk.f32.mxu0 %vm45_vm1, %v29_v20  ;;  %764 = vmatpush3.bf16.msra.mxu0 %v761_v16  ;;  %v781_v40 = vpack.c.bf16 %v274_v39, %v273_v38 }
  0x12   :  { %766 = vmatprep.subr.bf16.mxu0 %v765_v21  ;;  %788 = vmatprep.subr.bf16.mxu1 %v765_v21 }
  0x14   :  { %686 = vmatmul.mubr.msk.f32.gmra.mrb[8].mxu0 %vm45_vm1, %v30_v22  ;;  %796 = vmatpush3.bf16.msra.mxu1 %v765_v21 }
  0x15   :  { %688 = vmatprep.mubr.msk.f32.mxu0 %vm45_vm1, %v31_v25  ;;  %768 = vmatpush3.bf16.msra.mxu0 %v765_v21 }
  0x16   :  { %770 = vmatprep.subr.bf16.mxu0 %v769_v26  ;;  %789 = vmatprep.subr.bf16.mxu1 %v769_v26 }
  0x18   :  { %689 = vmatmul.mubr.msk.f32.gmra.mrb[10].mxu0 %vm45_vm1, %v32_v27  ;;  %797 = vmatpush3.bf16.msra.mxu1 %v769_v26 }
  0x19   :  { %691 = vmatprep.mubr.msk.f32.mxu0 %vm45_vm1, %v33_v30  ;;  %772 = vmatpush3.bf16.msra.mxu0 %v769_v26  ;;  %v621_v26 = vld [vmem:[%s1158_s4] ss:$0 sm:$0xff]  ;;  %s892_s4 = smov [#allocation2]  }
  0x1a   :  { %774 = vmatprep.subr.bf16.mxu0 %v773_v31  ;;  %790 = vmatprep.subr.bf16.mxu1 %v773_v31  ;;  %s592_s7 = sshll.u32 %s892_s4, 4  ;;  %s593_s7 = int_to_ptr.vmem [resolvable:$true] %s592_s7 }
  0x1b   :  { %s868_s8 = scalar_lea.vmem %s593_s7, 2048  ;;  %p873_p1 = scmp.lt.s32.totalorder %s593_s7, %s593_s7 }
  0x1c   :  { %692 = vmatmul.mubr.msk.f32.gmra.mrb[12].mxu0 %vm45_vm1, %v34_v32  ;;  %798 = vmatpush3.bf16.msra.mxu1 %v773_v31  ;;  %p869_p0 = scmp.ne.s32.totalorder %s593_s7, %s868_s8  ;;  %p874_p2 = scmp.lt.s32.totalorder %s868_s8, %s868_s8 }
  0x1d   :  { %694 = vmatprep.mubr.msk.f32.mxu0 %vm45_vm1, %v35_v35  ;;  %776 = vmatpush3.bf16.msra.mxu0 %v773_v31 }
  0x1e   :  { %778 = vmatprep.subr.bf16.mxu0 %v777_v36  ;;  %791 = vmatprep.subr.bf16.mxu1 %v777_v36  ;;  %p875_p3 = por %p874_p2, %p873_p1 }
  0x20   :  { %695 = vmatmul.mubr.msk.f32.gmra.mrb[14].mxu0 %vm45_vm1, %v36_v37  ;;  %799 = vmatpush3.bf16.msra.mxu1 %v777_v36  ;;  %p876_p4 = pnand %p875_p3, %p869_p0 }
  0x21   :  { %780 = vmatpush3.bf16.msra.mxu0 %v777_v36  ;;  %792 = vmatprep.subr.bf16.mxu1 %v781_v40 }
  0x22   :  { %782 = vmatprep.subr.bf16.mxu0 %v781_v40 }
  0x24   :  { %800 = vmatpush3.bf16.msra.mxu1 %v781_v40 }
  0x25   :  { %784 = vmatpush3.bf16.msra.mxu0 %v781_v40 }
  0xd7   :  { %v675_v42 = vpop.f32.mrb[0].mxu0 }
  0xd8   :  { %v170_v43 = vadd.f32 %v675_v42, %v603_v41  ;;  %v164_v44 = vpop.f32.mrb[1].mxu0 }
  0xd9   :  { %v165_v45 = vadd.f32 %v603_v41, %v164_v44 }
  0xda   :  { %v244_v48 = vmax.f32 %v170_v43, 0.0 }
  0xdb   :  { %v243_v46 = vmax.f32 %v165_v45, 0.0  ;;  %v678_v47 = vpop.f32.mrb[2].mxu0 }
  0xdc   :  { %v180_v49 = vadd.f32 %v678_v47, %v603_v41  ;;  %v174_v50 = vpop.f32.mrb[3].mxu0 }
  0xdd   :  { %v175_v51 = vadd.f32 %v603_v41, %v174_v50  ;;  %729 = vmatprep.mubr.f32.mxu0 %v243_v46 }
  0xde   :  { %730 = vmatmul.mubr.f32.vlgmr.msra.gmra.mrb[16].mxu0 %v244_v48  ;;  %v246_v54 = vmax.f32 %v180_v49, 0.0 }
  0xdf   :  { %v245_v52 = vmax.f32 %v175_v51, 0.0  ;;  %v681_v53 = vpop.f32.mrb[4].mxu0 }
  0xe0   :  { %v190_v55 = vadd.f32 %v681_v53, %v603_v41  ;;  %v184_v56 = vpop.f32.mrb[5].mxu0 }
  0xe1   :  { %v185_v57 = vadd.f32 %v603_v41, %v184_v56  ;;  %732 = vmatprep.mubr.f32.mxu0 %v245_v52 }
  0xe2   :  { %v248_v58 = vmax.f32 %v190_v55, 0.0  ;;  %733 = vmatmul.mubr.f32.gmra.mrb[18].mxu0 %v246_v54 }
  0xe3   :  { %v247_v59 = vmax.f32 %v185_v57, 0.0  ;;  %v684_v60 = vpop.f32.mrb[6].mxu0 }
  0xe4   :  { %v200_v61 = vadd.f32 %v684_v60, %v603_v41  ;;  %v194_v62 = vpop.f32.mrb[7].mxu0 }
  0xe5   :  { %735 = vmatprep.mubr.f32.mxu0 %v247_v59  ;;  %v195_v63 = vadd.f32 %v603_v41, %v194_v62 }
  0xe6   :  { %v250_v0 = vmax.f32 %v200_v61, 0.0  ;;  %736 = vmatmul.mubr.f32.gmra.mrb[20].mxu0 %v248_v58 }
  0xe7   :  { %v687_v1 = vpop.f32.mrb[8].mxu0  ;;  %v249_v2 = vmax.f32 %v195_v63, 0.0 }
  0xe8   :  { %v210_v3 = vadd.f32 %v687_v1, %v603_v41  ;;  %v204_v4 = vpop.f32.mrb[9].mxu0 }
  0xe9   :  { %v205_v5 = vadd.f32 %v603_v41, %v204_v4  ;;  %738 = vmatprep.mubr.f32.mxu1 %v249_v2 }
  0xea   :  { %v252_v6 = vmax.f32 %v210_v3, 0.0  ;;  %739 = vmatmul.mubr.f32.vlgmr.msra.gmra.mrb[0].mxu1 %v250_v0 }
  0xeb   :  { %v251_v7 = vmax.f32 %v205_v5, 0.0  ;;  %v690_v8 = vpop.f32.mrb[10].mxu0 }
  0xec   :  { %v220_v9 = vadd.f32 %v690_v8, %v603_v41  ;;  %v214_v10 = vpop.f32.mrb[11].mxu0 }
  0xed   :  { %v215_v11 = vadd.f32 %v603_v41, %v214_v10  ;;  %741 = vmatprep.mubr.f32.mxu1 %v251_v7 }
  0xee   :  { %v254_v12 = vmax.f32 %v220_v9, 0.0  ;;  %742 = vmatmul.mubr.f32.gmra.mrb[2].mxu1 %v252_v6 }
  0xef   :  { %v253_v13 = vmax.f32 %v215_v11, 0.0  ;;  %v693_v14 = vpop.f32.mrb[12].mxu0 }
  0xf0   :  { %v230_v15 = vadd.f32 %v693_v14, %v603_v41  ;;  %v224_v16 = vpop.f32.mrb[13].mxu0 }
  0xf1   :  { %v225_v17 = vadd.f32 %v603_v41, %v224_v16  ;;  %744 = vmatprep.mubr.f32.mxu1 %v253_v13 }
  0xf2   :  { %v256_v18 = vmax.f32 %v230_v15, 0.0  ;;  %745 = vmatmul.mubr.f32.gmra.mrb[4].mxu1 %v254_v12 }
  0xf3   :  { %v255_v19 = vmax.f32 %v225_v17, 0.0  ;;  %v696_v20 = vpop.f32.mrb[14].mxu0 }
  0xf4   :  { %v240_v21 = vadd.f32 %v696_v20, %v603_v41  ;;  %v234_v22 = vpop.f32.mrb[15].mxu0 }
  0xf5   :  { %v235_v23 = vadd.f32 %v603_v41, %v234_v22  ;;  %747 = vmatprep.mubr.f32.mxu1 %v255_v19 }
  0xf6   :  { %v258_v24 = vmax.f32 %v240_v21, 0.0  ;;  %748 = vmatmul.mubr.f32.gmra.mrb[6].mxu1 %v256_v18 }
  0xf7   :  { %v257_v25 = vmax.f32 %v235_v23, 0.0 }
  0xf9   :  { %750 = vmatprep.mubr.f32.mxu1 %v257_v25 }
  0xfa   :  { %751 = vmatmul.mubr.f32.gmra.mrb[8].mxu1 %v258_v24 }
 0x1b1   :  { %v731_v27 = vpop.f32.mrb[16].mxu0 }
 0x1b2   :  { %v354_v28 = vadd.f32 %v731_v27, %v621_v26  ;;  %v348_v29 = vpop.f32.mrb[17].mxu0 }
 0x1b3   :  { %v349_v31 = vadd.f32 %v621_v26, %v348_v29 }
 0x1b4   :  { %429 = vmax.xlane.f32.xlu0 %v354_v28 }
 0x1b5   :  { %v734_v30 = vpop.f32.mrb[18].mxu0 }
 0x1b6   :  { %v364_v32 = vadd.f32 %v734_v30, %v621_v26  ;;  %v358_v33 = vpop.f32.mrb[19].mxu0 }
 0x1b7   :  { %v359_v35 = vadd.f32 %v621_v26, %v358_v33 }
 0x1b8   :  { %433 = vmax.xlane.f32.xlu1 %v364_v32  ;;  %427 = vmax.xlane.f32.xlu0 %v349_v31 }
 0x1b9   :  { %v737_v34 = vpop.f32.mrb[20].mxu0 }
 0x1ba   :  { %v368_v36 = vpop.f32.mrb[21].mxu0  ;;  %v374_v39 = vadd.f32 %v737_v34, %v621_v26 }
 0x1bb   :  { %v369_v37 = vadd.f32 %v621_v26, %v368_v36 }
 0x1bc   :  { %431 = vmax.xlane.f32.xlu1 %v359_v35 }
 0x1bd   :  { %v740_v38 = vpop.f32.mrb[0].mxu1  ;;  %435 = vmax.xlane.f32.xlu0 %v369_v37 }
 0x1be   :  { %v378_v40 = vpop.f32.mrb[1].mxu1  ;;  %v384_v43 = vadd.f32 %v740_v38, %v621_v26 }
 0x1bf   :  { %v379_v41 = vadd.f32 %v621_v26, %v378_v40 }
 0x1c0   :  { %437 = vmax.xlane.f32.xlu1 %v374_v39 }
 0x1c1   :  { %v743_v42 = vpop.f32.mrb[2].mxu1  ;;  %439 = vmax.xlane.f32.xlu0 %v379_v41 }
 0x1c2   :  { %v388_v44 = vpop.f32.mrb[3].mxu1  ;;  %v1049_v47 = vadd.f32 %v743_v42, %v621_v26 }
 0x1c3   :  { %v1046_v45 = vadd.f32 %v621_v26, %v388_v44 }
 0x1c4   :  { %441 = vmax.xlane.f32.xlu1 %v384_v43 }
 0x1c5   :  { %v746_v46 = vpop.f32.mrb[4].mxu1  ;;  %443 = vmax.xlane.f32.xlu0 %v1046_v45 }
 0x1c6   :  { %v398_v48 = vpop.f32.mrb[5].mxu1  ;;  %v1055_v51 = vadd.f32 %v746_v46, %v621_v26 }
 0x1c7   :  { %v1051_v49 = vadd.f32 %v621_v26, %v398_v48 }
 0x1c8   :  { %445 = vmax.xlane.f32.xlu1 %v1049_v47 }
 0x1c9   :  { %v749_v50 = vpop.f32.mrb[6].mxu1  ;;  %447 = vmax.xlane.f32.xlu0 %v1051_v49 }
 0x1ca   :  { %v408_v52 = vpop.f32.mrb[7].mxu1  ;;  %v1061_v55 = vadd.f32 %v749_v50, %v621_v26 }
 0x1cb   :  { %v1057_v53 = vadd.f32 %v621_v26, %v408_v52 }
 0x1cc   :  { %449 = vmax.xlane.f32.xlu1 %v1055_v51 }
 0x1cd   :  { %v752_v54 = vpop.f32.mrb[8].mxu1  ;;  %451 = vmax.xlane.f32.xlu0 %v1057_v53 }
 0x1ce   :  { %v418_v56 = vpop.f32.mrb[9].mxu1  ;;  %v1067_v58 = vadd.f32 %v752_v54, %v621_v26 }
 0x1cf   :  { %v1063_v57 = vadd.f32 %v621_v26, %v418_v56 }
 0x1d0   :  { %453 = vmax.xlane.f32.xlu1 %v1061_v55 }
 0x1d1   :  { %455 = vmax.xlane.f32.xlu0 %v1063_v57 }
 0x1d4   :  { %457 = vmax.xlane.f32.xlu1 %v1067_v58 }
 0x241   :  { %v430_v59 = vpop.xlane.xlu0 %429 }
 0x242   :  { %v460_v60 = vsub.f32 %v354_v28, %v430_v59 }
 0x244   :  { %v477_v61 = vmul.f32 1.442695, %v460_v60 }
 0x245   :  { %v434_v62 = vpop.xlane.xlu1 %433  ;;  %v428_v63 = vpop.xlane.xlu0 %427 }
 0x246   :  { %804 = vpow2.f32 %v477_v61  ;;  %v462_v0 = vsub.f32 %v364_v32, %v434_v62  ;;  %v459_v1 = vsub.f32 %v349_v31, %v428_v63 }
 0x248   :  { %v481_v2 = vmul.f32 1.442695, %v462_v0  ;;  %v475_v3 = vmul.f32 1.442695, %v459_v1 }
 0x249   :  { %v432_v4 = vpop.xlane.xlu1 %431 }
 0x24a   :  { %806 = vpow2.f32 %v481_v2  ;;  %v461_v5 = vsub.f32 %v359_v35, %v432_v4  ;;  %v436_v6 = vpop.xlane.xlu0 %435 }
 0x24b   :  { %808 = vpow2.f32 %v475_v3  ;;  %v463_v7 = vsub.f32 %v369_v37, %v436_v6 }
 0x24c   :  { %v479_v8 = vmul.f32 1.442695, %v461_v5 }
 0x24d   :  { %v438_v9 = vpop.xlane.xlu1 %437  ;;  %v483_v12 = vmul.f32 1.442695, %v463_v7 }
 0x24e   :  { %810 = vpow2.f32 %v479_v8  ;;  %v464_v10 = vsub.f32 %v374_v39, %v438_v9  ;;  %v440_v11 = vpop.xlane.xlu0 %439 }
 0x24f   :  { %v465_v13 = vsub.f32 %v379_v41, %v440_v11 }
 0x250   :  { %v1070_v14 = vpop.eup %804  ;;  %v485_v15 = vmul.f32 1.442695, %v464_v10 }
 0x251   :  { %509 = vadd.xlane.f32.xlu1 %v1070_v14  ;;  %v442_v16 = vpop.xlane.xlu1 %441  ;;  %v487_v19 = vmul.f32 1.442695, %v465_v13 }
 0x252   :  { %812 = vpow2.f32 %v485_v15  ;;  %v466_v17 = vsub.f32 %v384_v43, %v442_v16  ;;  %v444_v18 = vpop.xlane.xlu0 %443 }
 0x253   :  { %814 = vpow2.f32 %v483_v12  ;;  %v467_v20 = vsub.f32 %v1046_v45, %v444_v18 }
 0x254   :  { %v1074_v21 = vpop.eup %806  ;;  %v489_v22 = vmul.f32 1.442695, %v466_v17 }
 0x255   :  { %v1076_v23 = vpop.eup %808  ;;  %513 = vadd.xlane.f32.xlu1 %v1074_v21  ;;  %v446_v24 = vpop.xlane.xlu1 %445  ;;  %v491_v27 = vmul.f32 1.442695, %v467_v20 }
 0x256   :  { %816 = vpow2.f32 %v489_v22  ;;  %v468_v25 = vsub.f32 %v1049_v47, %v446_v24  ;;  %507 = vadd.xlane.f32.xlu0 %v1076_v23  ;;  %v448_v26 = vpop.xlane.xlu0 %447 }
 0x257   :  { %818 = vpow2.f32 %v487_v19  ;;  %v469_v28 = vsub.f32 %v1051_v49, %v448_v26 }
 0x258   :  { %v1082_v29 = vpop.eup %810  ;;  %v493_v30 = vmul.f32 1.442695, %v468_v25 }
 0x259   :  { %v450_v31 = vpop.xlane.xlu1 %449  ;;  %v495_v34 = vmul.f32 1.442695, %v469_v28 }
 0x25a   :  { %820 = vpow2.f32 %v493_v30  ;;  %v470_v32 = vsub.f32 %v1055_v51, %v450_v31  ;;  %511 = vadd.xlane.f32.xlu0 %v1082_v29  ;;  %v452_v33 = vpop.xlane.xlu0 %451 }
 0x25b   :  { %822 = vpow2.f32 %v491_v27  ;;  %v471_v35 = vsub.f32 %v1057_v53, %v452_v33 }
 0x25c   :  { %v1087_v36 = vpop.eup %812  ;;  %v497_v37 = vmul.f32 1.442695, %v470_v32 }
 0x25d   :  { %v1089_v38 = vpop.eup %814  ;;  %517 = vadd.xlane.f32.xlu1 %v1087_v36  ;;  %v454_v39 = vpop.xlane.xlu1 %453  ;;  %v499_v42 = vmul.f32 1.442695, %v471_v35 }
 0x25e   :  { %824 = vpow2.f32 %v497_v37  ;;  %v472_v40 = vsub.f32 %v1061_v55, %v454_v39  ;;  %515 = vadd.xlane.f32.xlu0 %v1089_v38  ;;  %v456_v41 = vpop.xlane.xlu0 %455 }
 0x25f   :  { %826 = vpow2.f32 %v495_v34  ;;  %v473_v43 = vsub.f32 %v1063_v57, %v456_v41 }
 0x260   :  { %v1095_v44 = vpop.eup %816  ;;  %v501_v45 = vmul.f32 1.442695, %v472_v40 }
 0x261   :  { %v1097_v46 = vpop.eup %818  ;;  %521 = vadd.xlane.f32.xlu1 %v1095_v44  ;;  %v458_v47 = vpop.xlane.xlu1 %457  ;;  %v503_v49 = vmul.f32 1.442695, %v473_v43 }
 0x262   :  { %828 = vpow2.f32 %v501_v45  ;;  %v474_v48 = vsub.f32 %v1067_v58, %v458_v47  ;;  %519 = vadd.xlane.f32.xlu0 %v1097_v46 }
 0x263   :  { %830 = vpow2.f32 %v499_v42 }
 0x264   :  { %v1102_v50 = vpop.eup %820  ;;  %v505_v51 = vmul.f32 1.442695, %v474_v48 }
 0x265   :  { %v1104_v52 = vpop.eup %822  ;;  %525 = vadd.xlane.f32.xlu1 %v1102_v50 }
 0x266   :  { %832 = vpow2.f32 %v505_v51  ;;  %523 = vadd.xlane.f32.xlu0 %v1104_v52 }
 0x267   :  { %834 = vpow2.f32 %v503_v49 }
 0x268   :  { %v1108_v53 = vpop.eup %824 }
 0x269   :  { %v1110_v54 = vpop.eup %826  ;;  %529 = vadd.xlane.f32.xlu1 %v1108_v53 }
 0x26a   :  { %527 = vadd.xlane.f32.xlu0 %v1110_v54 }
 0x26c   :  { %v1114_v55 = vpop.eup %828 }
 0x26d   :  { %v1116_v56 = vpop.eup %830  ;;  %533 = vadd.xlane.f32.xlu1 %v1114_v55 }
 0x26e   :  { %531 = vadd.xlane.f32.xlu0 %v1116_v56 }
 0x270   :  { %v1120_v57 = vpop.eup %832 }
 0x271   :  { %v1122_v58 = vpop.eup %834  ;;  %537 = vadd.xlane.f32.xlu1 %v1120_v57 }
 0x272   :  { %535 = vadd.xlane.f32.xlu0 %v1122_v58 }
 0x2de   :  { %v510_v59 = vpop.xlane.xlu1 %509 }
 0x2df   :  { %836 = vrcp.f32 %v510_v59 }
 0x2e2   :  { %v514_v60 = vpop.xlane.xlu1 %513 }
 0x2e3   :  { %838 = vrcp.f32 %v514_v60  ;;  %v508_v61 = vpop.xlane.xlu0 %507 }
 0x2e4   :  { %840 = vrcp.f32 %v508_v61 }
 0x2e7   :  { %v512_v62 = vpop.xlane.xlu0 %511 }
 0x2e8   :  { %842 = vrcp.f32 %v512_v62 }
 0x2e9   :  { %v837_v63 = vpop.eup %836 }
 0x2ea   :  { %v556_v0 = vmul.f32 %v837_v63, %v1070_v14  ;;  %v518_v1 = vpop.xlane.xlu1 %517 }
 0x2eb   :  { %844 = vrcp.f32 %v518_v1  ;;  %v516_v2 = vpop.xlane.xlu0 %515 }
 0x2ec   :  { %572 = vst [vmem:[#allocation2 + $0x8] sm:$0xff] %v556_v0  ;;  %846 = vrcp.f32 %v516_v2 }
 0x2ed   :  { %v839_v3 = vpop.eup %838 }
 0x2ee   :  { %v841_v4 = vpop.eup %840  ;;  %v558_v5 = vmul.f32 %v839_v3, %v1074_v21  ;;  %v522_v6 = vpop.xlane.xlu1 %521 }
 0x2ef   :  { %v555_v7 = vmul.f32 %v841_v4, %v1076_v23  ;;  %848 = vrcp.f32 %v522_v6  ;;  %v520_v8 = vpop.xlane.xlu0 %519 }
 0x2f0   :  { %574 = vst [vmem:[#allocation2 + $0x18] sm:$0xff] %v558_v5  ;;  %850 = vrcp.f32 %v520_v8 }
 0x2f1   :  { %571 = vst [vmem:[#allocation2] sm:$0xff] %v555_v7 }
 0x2f2   :  { %v843_v9 = vpop.eup %842  ;;  %v526_v10 = vpop.xlane.xlu1 %525 }
 0x2f3   :  { %v557_v11 = vmul.f32 %v843_v9, %v1082_v29  ;;  %852 = vrcp.f32 %v526_v10  ;;  %v524_v12 = vpop.xlane.xlu0 %523 }
 0x2f4   :  { %854 = vrcp.f32 %v524_v12 }
 0x2f5   :  { %v845_v13 = vpop.eup %844  ;;  %573 = vst [vmem:[#allocation2 + $0x10] sm:$0xff] %v557_v11 }
 0x2f6   :  { %v847_v14 = vpop.eup %846  ;;  %v560_v15 = vmul.f32 %v845_v13, %v1087_v36  ;;  %v530_v16 = vpop.xlane.xlu1 %529 }
 0x2f7   :  { %v559_v17 = vmul.f32 %v847_v14, %v1089_v38  ;;  %856 = vrcp.f32 %v530_v16  ;;  %v528_v18 = vpop.xlane.xlu0 %527 }
 0x2f8   :  { %576 = vst [vmem:[#allocation2 + $0x28] sm:$0xff] %v560_v15  ;;  %858 = vrcp.f32 %v528_v18 }
 0x2f9   :  { %v849_v19 = vpop.eup %848  ;;  %575 = vst [vmem:[#allocation2 + $0x20] sm:$0xff] %v559_v17 }
 0x2fa   :  { %v851_v20 = vpop.eup %850  ;;  %v562_v21 = vmul.f32 %v849_v19, %v1095_v44  ;;  %v534_v22 = vpop.xlane.xlu1 %533 }
 0x2fb   :  { %v561_v23 = vmul.f32 %v851_v20, %v1097_v46  ;;  %860 = vrcp.f32 %v534_v22  ;;  %v532_v24 = vpop.xlane.xlu0 %531 }
 0x2fc   :  { %578 = vst [vmem:[#allocation2 + $0x38] sm:$0xff] %v562_v21  ;;  %862 = vrcp.f32 %v532_v24 }
 0x2fd   :  { %v853_v25 = vpop.eup %852  ;;  %577 = vst [vmem:[#allocation2 + $0x30] sm:$0xff] %v561_v23 }
 0x2fe   :  { %v855_v26 = vpop.eup %854  ;;  %v564_v27 = vmul.f32 %v853_v25, %v1102_v50  ;;  %v538_v28 = vpop.xlane.xlu1 %537 }
 0x2ff   :  { %v563_v29 = vmul.f32 %v855_v26, %v1104_v52  ;;  %864 = vrcp.f32 %v538_v28  ;;  %v536_v30 = vpop.xlane.xlu0 %535 }
 0x300   :  { %580 = vst [vmem:[#allocation2 + $0x48] sm:$0xff] %v564_v27  ;;  %866 = vrcp.f32 %v536_v30 }
 0x301   :  { %v857_v31 = vpop.eup %856  ;;  %579 = vst [vmem:[#allocation2 + $0x40] sm:$0xff] %v563_v29 }
 0x302   :  { %v859_v32 = vpop.eup %858  ;;  %v566_v33 = vmul.f32 %v857_v31, %v1108_v53 }
 0x303   :  { %v565_v34 = vmul.f32 %v859_v32, %v1110_v54 }
 0x304   :  { %582 = vst [vmem:[#allocation2 + $0x58] sm:$0xff] %v566_v33 }
 0x305   :  { %v861_v35 = vpop.eup %860  ;;  %581 = vst [vmem:[#allocation2 + $0x50] sm:$0xff] %v565_v34 }
 0x306   :  { %v863_v36 = vpop.eup %862  ;;  %v568_v37 = vmul.f32 %v861_v35, %v1114_v55 }
 0x307   :  { %v567_v38 = vmul.f32 %v863_v36, %v1116_v56 }
 0x308   :  { %584 = vst [vmem:[#allocation2 + $0x68] sm:$0xff] %v568_v37 }
 0x309   :  { %v865_v39 = vpop.eup %864  ;;  %583 = vst [vmem:[#allocation2 + $0x60] sm:$0xff] %v567_v38 }
 0x30a   :  { %v867_v40 = vpop.eup %866  ;;  %v570_v41 = vmul.f32 %v865_v39, %v1120_v57 }
 0x30b   :  { %v569_v42 = vmul.f32 %v867_v40, %v1122_v58 }
 0x30c   :  { %586 = vst [vmem:[#allocation2 + $0x78] sm:$0xff] %v570_v41 }
 0x30d   :  { %585 = vst [vmem:[#allocation2 + $0x70] sm:$0xff] %v569_v42 }
 0x30e   :  { %879 = shalt.err (!%p876_p4)
}
 0x30f   :  { %s880_s11 = scalar_lea.hbm %s1159_s5, 2048 }
 0x310   :  { %p881_p5 = scmp.ne.s32.totalorder %s1159_s5, %s880_s11  ;;  %p884_p6 = scmp.lt.u32.totalorder %s880_s11, %s1159_s5 }
 0x312   :  { %p886_p7 = pnand %p884_p6, %p881_p5 }
 0x314   :  { %889 = shalt.err (!%p886_p7)
}
 0x315   :  { %s893_s16 = smov 128   ;;  %s894_s17 = smov 8  }
 0x316   :  { %598 = dma.vmem_to_hbm [thread:$0]  %s593_s7, 2048, %s1159_s5, [#allocation3], %s893_s16, %s893_s16, %s894_s17  }
 0x317   :  { %890 = dma.done.wait [#allocation3], 2048  }
 0x318   :  { %891 = vsyncadd [#allocation3], 4294965248 }
 0x319   :  { %602 = vsyncpa [#allocation3], 1 }

</bundles_post_ra>
